<compile_context>
chip_gen: v6e
topology: v6e:2x2x1
jax: 0.10.0
libtpu: 0.0.40
codegen_flags: <defaults>
</compile_context>

<pallas_src>
import functools

import jax
import jax.numpy as jnp
from jax.experimental import pallas as pl
from jax.experimental.pallas import tpu as pltpu
import numpy as np


def lmd_vit_embeddings_kernel(patches_ref, wpat_ref, pooled_ref, pos_ref, out_ref):
    # Per grid step = (one tile of TN patch rows, one batch element).
    #   patches_ref: (TN, CPP) bf16      wpat_ref: (CPP, H) bf16 (resident)
    #   pooled_ref:  (1,  H)   bf16      pos_ref:  (TN, H)  bf16 (reused across batch)
    #   out_ref:     (TN, H)
    emb = jnp.dot(patches_ref[...], wpat_ref[...],
                  preferred_element_type=jnp.float32)
    out_ref[...] = (emb
                    + pooled_ref[...].astype(jnp.float32)
                    + pos_ref[...].astype(jnp.float32)).astype(out_ref.dtype)
    # TODO(synk): nn.Dropout with p > 0 in training mode would need
    # pltpu.prng_seed/prng_random_bits masking; modeled as identity (eval) here.


def extract_patches(pixel_values, patch_size):
    """im2col glue (pure layout, no compute): NCHW -> [B, N, C*P*P].

    Matches ViTPatchEmbeddings' conv(x).flatten(2).transpose(1, 2) with patch
    vectors flattened in (C, ph, pw) order and patches row-major over (hn, wn).
    """
    B, C, Himg, Wimg = pixel_values.shape
    P = patch_size
    Hn, Wn = Himg // P, Wimg // P
    x = pixel_values.reshape(B, C, Hn, P, Wn, P)
    x = x.transpose(0, 2, 4, 1, 3, 5)          # B, Hn, Wn, C, P, P
    return x.reshape(B, Hn * Wn, C * P * P)


def _vmem_budget_and_limit():
    """Generation-aware tiling budget and scoped-VMEM limit (bytes)."""
    mib = 1024 * 1024
    try:
        cap = int(pltpu.get_tpu_info().vmem_capacity_bytes)
    except Exception:
        cap = 64 * mib                      # conservative (v7x per-TC size)
    budget = min((cap * 2) // 3, 96 * mib)  # ~85 MiB on v5e/v6e, ~42 MiB on v7x
    limit = min(cap - 8 * mib, budget + 12 * mib)
    return budget, limit


def _pick_tile_n(N, CPP, H, in_bytes, out_bytes, vmem_budget_bytes,
                 align=128, max_rows=1024):
    """Pick the patch-row tile TN.

    Honest footprint: double-buffered patch/pos/out tiles, the (default
    double-buffered) resident weight, the pooled row buffers, and the f32
    matmul-result temp Mosaic materializes before the epilogue adds.
    """
    def footprint(tn):
        return (2 * tn * CPP * in_bytes      # patch tiles (double-buffered)
                + 2 * tn * H * in_bytes      # pos tiles (double-buffered)
                + 2 * tn * H * out_bytes     # output tiles (double-buffered)
                + 2 * CPP * H * in_bytes     # w_patch (default double-buffered)
                + 2 * 1 * H * in_bytes       # pooled row buffers
                + tn * H * 4)                # f32 dot-result temp
    if N <= align:
        return N                             # one full-dim tile (always legal)
    # Largest 128-aligned tile below N that fits the budget -> >=2 n-tiles,
    # MXU/sublane-aligned rows, partial last tile handled by cdiv grid.
    cands = range(align, min(N - 1, max_rows) + 1, align)
    for tn in sorted(cands, reverse=True):
        if footprint(tn) <= vmem_budget_bytes:
            return tn
    return align  # smallest aligned tile; only reached for extreme CPP*H


def lmd_vit_embeddings(pixel_values, latent_motion_tokens, params, patch_size,
                       compute_dtype=jnp.bfloat16, out_dtype=None):
    B, C, Himg, Wimg = pixel_values.shape
    P = patch_size
    N = (Himg // P) * (Wimg // P)              # num_patches
    CPP = C * P * P
    H = params["w_patch"].shape[1]             # hidden_size
    if out_dtype is None:
        out_dtype = compute_dtype              # downstream encoder dtype (halves store bytes)

    # ---- XLA-side prep (layout + tiny matmuls; fused under the enclosing jit).
    # Cast to bf16 BEFORE the im2col transpose so the layout copy moves half
    # the bytes; allow_input_fusion lets XLA fuse it into the pallas input DMA.
    patches = extract_patches(pixel_values.astype(compute_dtype), P)   # [B, N, CPP]

    # Query pooling hoisted out of the kernel: one well-shaped batched matmul.
    lmt_flat = latent_motion_tokens.reshape(B, -1).astype(jnp.float32)  # [B, Q*H]
    pooled = (lmt_flat @ params["w_pool"].astype(jnp.float32)
              + params["b_pool"].astype(jnp.float32))
    pooled = pooled.reshape(B, 1, H).astype(compute_dtype)              # [B, 1, H]

    # Fold the batch-invariant conv bias into the position table; narrow to bf16
    # (adds happen in f32 inside the kernel).
    pos_plus = (params["pos_emb"].astype(jnp.float32)
                + params["b_patch"].astype(jnp.float32)).astype(compute_dtype)  # [N, H]

    w_patch = params["w_patch"].astype(compute_dtype)                   # [CPP, H]

    in_bytes = jnp.dtype(compute_dtype).itemsize
    out_bytes = jnp.dtype(out_dtype).itemsize
    vmem_budget, vmem_limit = _vmem_budget_and_limit()
    TN = _pick_tile_n(N, CPP, H, in_bytes, out_bytes, vmem_budget)
    n_tiles = pl.cdiv(N, TN)

    return pl.pallas_call(
        lmd_vit_embeddings_kernel,
        out_shape=jax.ShapeDtypeStruct((B, N, H), out_dtype),
        grid_spec=pltpu.PrefetchScalarGridSpec(
            num_scalar_prefetch=0,
            # Batch innermost: pos (and w_patch) block indices are constant
            # across the inner axis, so Pallas fetches them once per n-tile and
            # reuses the VMEM buffer for every batch element.
            grid=(n_tiles, B),
            in_specs=[
                pl.BlockSpec((None, TN, CPP), lambda n, b: (b, n, 0)),  # patches
                pl.BlockSpec((CPP, H), lambda n, b: (0, 0)),            # w_patch (resident)
                pl.BlockSpec((None, 1, H), lambda n, b: (b, 0, 0)),     # pooled row
                pl.BlockSpec((TN, H), lambda n, b: (n, 0)),             # pos + conv bias
            ],
            out_specs=pl.BlockSpec((None, TN, H), lambda n, b: (b, n, 0)),
        ),
        compiler_params=pltpu.CompilerParams(
            dimension_semantics=("parallel", "parallel"),
            vmem_limit_bytes=vmem_limit,
            allow_input_fusion=[True, False, False, False],
        ),
    )(patches, w_patch, pooled, pos_plus)


def reference(pixel_values, latent_motion_tokens, params, patch_size):
    """Pure-JAX fp32 reference mirroring the PyTorch forward."""
    B = pixel_values.shape[0]
    patches = extract_patches(pixel_values, patch_size)
    emb = patches @ params["w_patch"] + params["b_patch"]          # patch_embeddings
    lmt = latent_motion_tokens.reshape(B, 1, -1)
    pooled = lmt @ params["w_pool"] + params["b_pool"]             # query_pooling_layer
    emb = emb + pooled                                             # 'add' fusion
    emb = emb + params["pos_emb"][None]                            # position_embeddings
    return emb                                                     # dropout = identity


if __name__ == "__main__":
    # Small config consistent with the module:
    #   batch=2, channels=4, image=16x16, patch=4 -> num_patches=16,
    #   hidden_size=32, query_num=4.
    B, C, IMG, P = 2, 4, 16, 4
    HIDDEN, Q = 32, 4
    N = (IMG // P) ** 2
    CPP = C * P * P
    QH = Q * HIDDEN

    key = jax.random.PRNGKey(0)
    k_pix, k_lmt, k_convw, k_convb, k_poolw, k_poolb, k_pos = jax.random.split(key, 7)

    pixel_values = jax.random.normal(k_pix, (B, C, IMG, IMG), dtype=jnp.float32)
    latent_motion_tokens = jax.random.normal(k_lmt, (B, Q, HIDDEN), dtype=jnp.float32)

    # Deterministic parameter init (shapes from the module's __init__).
    # Conv2d(C, HIDDEN, kernel=P, stride=P) weight [HIDDEN, C, P, P] -> matmul form.
    conv_w = jax.random.normal(k_convw, (HIDDEN, C, P, P), dtype=jnp.float32) * 0.02
    params = {
        "w_patch": conv_w.reshape(HIDDEN, CPP).T,                             # [CPP, HIDDEN]
        "b_patch": (jax.random.normal(k_convb, (1, HIDDEN)) * 0.02).astype(jnp.float32),
        "w_pool": (jax.random.normal(k_poolw, (QH, HIDDEN)) * 0.02).astype(jnp.float32),
        "b_pool": (jax.random.normal(k_poolb, (1, HIDDEN)) * 0.02).astype(jnp.float32),
        "pos_emb": jax.random.normal(k_pos, (N, HIDDEN), dtype=jnp.float32),  # torch.randn(1,N,H)
    }

    fwd = jax.jit(functools.partial(lmd_vit_embeddings, patch_size=P))
    out = fwd(pixel_values, latent_motion_tokens, params)
    out = jax.block_until_ready(out)

    ref = reference(pixel_values, latent_motion_tokens, params, P)
    # bf16 MXU inputs, bf16 pos/pooled, f32 accumulation, bf16 output.
    out_f32 = np.asarray(out).astype(np.float32)
    np.testing.assert_allclose(out_f32, np.asarray(ref), rtol=2e-2, atol=6e-2)
    assert out.shape == (B, N, HIDDEN)

    print("KERNEL_OK")
</pallas_src>

<mosaic_0001>
module attributes {stable_mosaic.version = 11 : i64} {
  func.func @lmd_vit_embeddings_kernel(%arg0: i32, %arg1: i32, %arg2: memref<1x16x64xbf16, #tpu.memory_space<vmem>>, %arg3: memref<64x32xbf16, #tpu.memory_space<vmem>>, %arg4: memref<1x1x32xbf16, #tpu.memory_space<vmem>>, %arg5: memref<16x32xbf16, #tpu.memory_space<vmem>>, %arg6: memref<1x16x32xbf16, #tpu.memory_space<vmem>>) attributes {dimension_semantics = [#tpu.dimension_semantics<parallel>, #tpu.dimension_semantics<parallel>], iteration_bounds = array<i64: 1, 2>, scalar_prefetch = 0 : i64, scratch_operands = 0 : i64, tpu.core_type = #tpu.core_type<tc>, window_params = [{transform_indices = @transform_0, window_bounds = array<i64: 1, 16, 64>}, {pipeline_mode = #tpu.pipeline_mode<synchronous>, transform_indices = @transform_1, window_bounds = array<i64: 64, 32>}, {transform_indices = @transform_2, window_bounds = array<i64: 1, 1, 32>}, {transform_indices = @transform_3, window_bounds = array<i64: 16, 32>}, {transform_indices = @transform_4, window_bounds = array<i64: 1, 16, 32>}]} {
    %c0 = arith.constant 0 : index
    %c0_0 = arith.constant 0 : index
    %c0_1 = arith.constant 0 : index
    %0 = vector.load %arg2[%c0, %c0_0, %c0_1] : memref<1x16x64xbf16, #tpu.memory_space<vmem>>, vector<1x16x64xbf16>
    %1 = vector.shape_cast %0 : vector<1x16x64xbf16> to vector<16x64xbf16>
    %c0_2 = arith.constant 0 : index
    %c0_3 = arith.constant 0 : index
    %2 = vector.load %arg3[%c0_2, %c0_3] : memref<64x32xbf16, #tpu.memory_space<vmem>>, vector<64x32xbf16>
    %cst = arith.constant dense<0.000000e+00> : vector<16x32xf32>
    %3 = tpu.matmul %1, %2, %cst {dimension_numbers = #tpu.dot_dimension_numbers<[1], [0], [0], [1], [0, 0, 1, 1], [], []>} : vector<16x64xbf16>, vector<64x32xbf16>, vector<16x32xf32> -> vector<16x32xf32>
    %c0_4 = arith.constant 0 : index
    %c0_5 = arith.constant 0 : index
    %c0_6 = arith.constant 0 : index
    %4 = vector.load %arg4[%c0_4, %c0_5, %c0_6] : memref<1x1x32xbf16, #tpu.memory_space<vmem>>, vector<1x1x32xbf16>
    %5 = vector.shape_cast %4 : vector<1x1x32xbf16> to vector<1x32xbf16>
    %6 = arith.extf %5 : vector<1x32xbf16> to vector<1x32xf32>
    %7 = vector.broadcast %6 : vector<1x32xf32> to vector<16x32xf32>
    %8 = arith.addf %3, %7 : vector<16x32xf32>
    %c0_7 = arith.constant 0 : index
    %c0_8 = arith.constant 0 : index
    %9 = vector.load %arg5[%c0_7, %c0_8] : memref<16x32xbf16, #tpu.memory_space<vmem>>, vector<16x32xbf16>
    %10 = arith.extf %9 : vector<16x32xbf16> to vector<16x32xf32>
    %11 = arith.addf %8, %10 : vector<16x32xf32>
    %12 = arith.truncf %11 : vector<16x32xf32> to vector<16x32xbf16>
    %c0_9 = arith.constant 0 : index
    %c0_10 = arith.constant 0 : index
    %c0_11 = arith.constant 0 : index
    %13 = vector.load %arg6[%c0_9, %c0_10, %c0_11] : memref<1x16x32xbf16, #tpu.memory_space<vmem>>, vector<1x16x32xbf16>
    %14 = vector.shape_cast %13 : vector<1x16x32xbf16> to vector<16x32xbf16>
    %15 = vector.shape_cast %12 : vector<16x32xbf16> to vector<1x16x32xbf16>
    tpu.vector_store %arg6[%c0_9, %c0_10, %c0_11], %15 {strides = array<i32>} : memref<1x16x32xbf16, #tpu.memory_space<vmem>>, vector<1x16x32xbf16>,
    return
  }
  func.func @transform_0(%arg0: i32, %arg1: i32) -> (i32, i32, i32) {
    %c0_i32 = arith.constant 0 : i32
    %c0_i32_0 = arith.constant 0 : i32
    return %arg1, %arg0, %c0_i32 : i32, i32, i32
  }
  func.func @transform_1(%arg0: i32, %arg1: i32) -> (i32, i32) {
    %c0_i32 = arith.constant 0 : i32
    %c0_i32_0 = arith.constant 0 : i32
    %c0_i32_1 = arith.constant 0 : i32
    return %c0_i32, %c0_i32_0 : i32, i32
  }
  func.func @transform_2(%arg0: i32, %arg1: i32) -> (i32, i32, i32) {
    %c0_i32 = arith.constant 0 : i32
    %c0_i32_0 = arith.constant 0 : i32
    %c0_i32_1 = arith.constant 0 : i32
    return %arg1, %c0_i32, %c0_i32_0 : i32, i32, i32
  }
  func.func @transform_3(%arg0: i32, %arg1: i32) -> (i32, i32) {
    %c0_i32 = arith.constant 0 : i32
    %c0_i32_0 = arith.constant 0 : i32
    return %arg0, %c0_i32 : i32, i32
  }
  func.func @transform_4(%arg0: i32, %arg1: i32) -> (i32, i32, i32) {
    %c0_i32 = arith.constant 0 : i32
    %c0_i32_0 = arith.constant 0 : i32
    return %arg1, %arg0, %c0_i32 : i32, i32, i32
  }
}

</mosaic_0001>

<bundles_post_ra>
// kernel: lmd_vit_embeddings.1
= control target key start
LH: loop header
LB: loop body
LE: loop exit
PB: predicated region body
PF: predicated region fallthrough
CT: control target
= control target key end

     0   :  { %9 = vsyncpa [#allocation3], 0  ;;  %s841_s0 = inlined_call_operand.vmem [shape: bf16[2,16,64], index: 0, kind: input, shape index: {}]   ;;  %s842_s1 = inlined_call_operand.vmem [shape: bf16[64,32], index: 1, kind: input, shape index: {}]   ;;  %s843_s2 = inlined_call_operand.vmem [shape: bf16[2,1,32], index: 2, kind: input, shape index: {}]   ;;  %s844_s3 = inlined_call_operand.vmem [shape: bf16[16,32], index: 3, kind: input, shape index: {}]   ;;  %s845_s4 = inlined_call_operand.hbm [shape: bf16[2,16,32], index: 4, kind: output, shape index: {}]  }
   0x1   :  { %11 = vsyncpa [#allocation3 + $0x1], 0  ;;  %s709_s15 = smov 0   ;;  %s711_s16 = smov 0  }
   0x2   :  { %s713_s17 = smov 0   ;;  %s715_s18 = smov 0  }
   0x3   :  { %s717_s19 = smov 0   ;;  %s719_s20 = smov 0  }
   0x4 LB: > { %s490_s21 = sadd.s32 4294967295, %s677_s20   ;;  %s491_s22 = sadd.s32 4294967294, %s677_s20   ;;  %s677_s20 = sphi %s719_s20, %s17_s20   ;;  %s673_s19 = sphi %s717_s19, %s852_s19   ;;  %s669_s18 = sphi %s715_s18, %s851_s18   ;;  %s665_s17 = sphi %s713_s17, %s850_s17   ;;  %s661_s16 = sphi %s711_s16, %s849_s16   ;;  %s657_s15 = sphi %s709_s15, %s848_s15  }
   0x5   : > { %s26_s23 = sadd.s32 1, %s673_s19  ;;  %s139_s24 = sadd.s32 1, %s665_s17 }
   0x6   : > { %p27_p0 = scmp.ge.s32.totalorder %s26_s23, 2  ;;  %p149_p1 = scmp.ne.s32.totalorder %s665_s17, %s661_s16 }
   0x7   : > { %p150_p2 = scmp.eq.s32.totalorder %s490_s21, 1  ;;  %p155_p3 = scmp.ne.s32.totalorder %s661_s16, %s657_s15 }
   0x8   : > { %s854_s23 = smov (%p27_p0, %s26_s23), 0  ;;  %p156_p5 = scmp.eq.s32.totalorder %s491_s22, 1 }
   0x9   : > { %p749_p4 = por %p150_p2, %p149_p1  ;;  %s134_s26 = ssub.s32 %s673_s19, %s854_s23 }
   0xa   : > { %p495_p6 = scmp.ge.s32.totalorder %s677_s20, 1  ;;  %p137_p7 = scmp.eq.s32.totalorder %s134_s26, 0 }
   0xb   : > { %p756_p8 = por %p156_p5, %p155_p3  ;;  %p205_p9 = scmp.lt.s32.totalorder %s677_s20, 3 }
   0xc   : > { %s762_s28 = scalar_select %p137_p7, %s665_s17, %s139_s24  }
   0xd   : > { %p206_p10 = pnand %p495_p6, %p205_p9 }
   0xe   : > { %p244_p11 = scmp.lt.s32.totalorder (!%p206_p10), %s669_s18, 1  ;;  %s240_s5 = sand.u32 (!%p206_p10), 1, %s661_s16  }
   0xf   : > { %209 = sbr.rel (%p206_p10) target bundleno = 254 (0xfe), region = 36  ;;  %s496_s6 = sshll.u32 (!%p206_p10), %s240_s5, 3 }
  0x10   : > { %s242_s8 = scalar_lea.vmem (!%p206_p10), [#allocation2], %s496_s6  ;;  %s681_s14 = smov (!%p206_p10), [#allocation2]  }
  0x11   : > { %s387_s9 = sshll.u32 (!%p206_p10), %s242_s8, 4  ;;  %s605_s21 = sshll.u32 (!%p206_p10), %s681_s14, 4  ;;  %s794_s9 = int_to_ptr.vmem [resolvable:$true] %s387_s9  ;;  %s606_s21 = int_to_ptr.vmem [resolvable:$false] %s605_s21 }
  0x12   : > { %s607_s22 = scalar_lea.vmem (!%p206_p10), %s606_s21, 256  ;;  %p608_p1 = scmp.lt.s32.totalorder (!%p206_p10), %s794_s9, %s606_s21 }
  0x14   : > { %v596_v0 = vld [vmem:[%s842_s1 + $0x18] sm:$0xff]   ;;  %v679_v1 = vmov 0.0   ;;  %v597_v2 = vld [vmem:[%s842_s1 + $0x10] sm:$0xff]   ;;  %vm680_vm0 = vmmov 0   ;;  %s245_s7 = scalar_select %p244_p11, %s669_s18, 1  ;;  %v598_v3 = vld [vmem:[%s842_s1 + $0x8] sm:$0xff]   ;;  %v276_v6 = vlaneseq }
  0x15   : > { %525 = vmatprep.subr.bf16.mxu0 %v679_v1  ;;  %533 = vmatprep.mubr.msk.bf16.mxu0 %vm680_vm0, %v679_v1  ;;  %v599_v4 = vld [vmem:[%s842_s1] sm:$0xff]   ;;  %vm309_vm1 = vcmask 523264   ;;  %vm368_vm2 = vcmask 257024  }
  0x16   : > { %526 = vmatpush3.bf16.msra.mxu0 %v596_v0  ;;  %s512_s10 = sshll.u32 %s245_s7, 3  ;;  %s255_s26 = scalar_lea.vmem %s843_s2, %s245_s7  ;;  %v277_v7 = vshrl.u32 %v276_v6, 7  ;;  %v517_v11 = vld [vmem:[%s844_s3] sm:$0xff]  }
  0x17   : > { %527 = vmatprep.subr.bf16.mxu0 %v679_v1  ;;  %s251_s13 = scalar_lea.vmem %s841_s0, %s512_s10  ;;  %v274_v8 = vld [vmem:[%s255_s26] sm:$0x1]  ;;  %v518_v13 = vunpack.c.l.bf16 %v517_v11  ;;  %v519_v18 = vunpack.c.h.bf16 %v517_v11  ;;  %s515_s7 = sshll.u32 %s669_s18, 7 }
  0x18   : > { %v600_v5 = vld [vmem:[%s251_s13] sm:$0xff]   ;;  %v275_v9 = vunpack.c.l.bf16 %v274_v8  ;;  %v278_v10 = vsub.s32 0, %v277_v7  ;;  %s792_s12 = scalar_lea.hbm %s845_s4, %s515_s7  ;;  %s796_s13 = scalar_lea.sflag [#allocation3], %s240_s5 }
  0x19   : > { %s601_s18 = scalar_lea.vmem %s794_s9, 128 }
  0x1a   : > { %528 = vmatpush3.bf16.msra.mxu0 %v597_v2  ;;  %v279_v12 = vrot.slane %v275_v9, %v278_v10  ;;  %p602_p12 = scmp.ne.s32.totalorder %s794_s9, %s601_s18  ;;  %p609_p2 = scmp.lt.s32.totalorder %s607_s22, %s601_s18 }
  0x1b   : > { %529 = vmatprep.subr.bf16.mxu0 %v679_v1 }
  0x1c   : > { %p603_p13 = pnand %p602_p12, %p749_p4  ;;  %p610_p3 = por %p609_p2, %p608_p1 }
  0x1e   : > { %530 = vmatpush3.bf16.msra.mxu0 %v598_v3  ;;  %p604_p0 = pneg %p603_p13 }
  0x1f   : > { %531 = vmatprep.subr.bf16.mxu0 %v679_v1 }
  0x20   : > { %p611_p5 = pnand %p610_p3, %p604_p0 }
  0x22   : > { %532 = vmatpush3.bf16.msra.mxu0 %v599_v4 }
  0x25   : > { %534 = vmatmul.mubr.msk.bf16.vlgmr.msra.gmra.mxu0 %vm309_vm1, %v600_v5 }
  0xe5   : > { %v347_v14 = vpop.f32.mrf.mxu0 }
  0xe6   : > { %v348_v15 = vadd.f32 %v347_v14, %v279_v12 }
  0xe7   : > { %v535_v16 = vpop.f32.mrf.mxu0 }
  0xe8   : > { %v358_v17 = vadd.f32 %v518_v13, %v348_v15 }
  0xe9   : > { %v350_v19 = vpop.f32.mrf.mxu0 }
  0xea   : > { %v513_v20 = vpack.c.bf16 %v358_v17, %v358_v17  ;;  %v351_v21 = vadd.f32 %v350_v19, %v279_v12 }
  0xeb   : > { %v536_v22 = vpop.f32.mrf.mxu0 }
  0xec   : > { %369 = vst.msk [vmem:[%s242_s8] sm:$0xf] %vm368_vm2, %v513_v20  ;;  %v359_v23 = vadd.f32 %v519_v18, %v351_v21 }
  0xee   : > { %v514_v24 = vpack.c.bf16 %v359_v23, %v359_v23 }
  0xf0   : > { %370 = vst.msk [vmem:[%s242_s8 + $0x4] sm:$0xf] %vm368_vm2, %v514_v24 }
  0xf1   : > { %614 = shalt.err (!%p611_p5)
}
  0xf2   : > { %s615_s24 = scalar_lea.hbm %s792_s12, 128  ;;  %s619_s30 = scalar_lea.hbm %s845_s4, 256 }
  0xf3   : > { %p616_p6 = scmp.ne.s32.totalorder %s792_s12, %s615_s24  ;;  %p620_p10 = scmp.lt.s32.totalorder %s792_s12, %s845_s4 }
  0xf4   : > { %p621_p11 = scmp.lt.s32.totalorder %s619_s30, %s615_s24 }
  0xf5   : > { %p617_p7 = pnand %p616_p6, %p749_p4 }
  0xf6   : > { %p622_p12 = por %p621_p11, %p620_p10 }
  0xf7   : > { %p618_p9 = pneg %p617_p7 }
  0xf9   : > { %p623_p13 = pnand %p622_p12, %p618_p9 }
  0xfb   : > { %626 = shalt.err (!%p623_p13)
}
  0xfc   : > { %s682_s7 = smov 64   ;;  %s683_s8 = smov 4  }
  0xfd   : > { %537 = dma.vmem_to_hbm [thread:$0]  (%p749_p4), %s794_s9, 128, %s792_s12, %s796_s13, %s682_s7, %s682_s7, %s683_s8  }
  0xfe PF: > { %p543_p0 = scmp.ge.s32.totalorder %s677_s20, 2  ;;  %s402_s10 = sand.u32 1, %s657_s15  }
  0xff   : > { %s403_s11 = scalar_lea.sflag [#allocation3], %s402_s10 }
 0x100   : > { %p540_p1 = pnand %p543_p0, %p756_p8 }
 0x102   : > { %p541_p2 = pneg %p540_p1 }
 0x104   : > { %652 = dma.done.wait (%p541_p2), %s403_s11, 128  }
 0x105   : > { %654 = vsyncadd (%p541_p2), %s403_s11, 4294967168  ;;  %s17_s20 = sadd.s32 1, %s677_s20   ;;  %s848_s15 = smov %s661_s16 }
 0x106   : > { %p14_p3 = scmp.ge.s32.totalorder %s17_s20, 4   ;;  %s849_s16 = smov %s665_s17 }
 0x107   : > { %s850_s17 = smov %s762_s28  ;;  %s851_s18 = smov %s673_s19 }
 0x108   : > { %s852_s19 = smov %s854_s23  ;;  %16 = sbr.rel (!%p14_p3) target bundleno = 4 (0x4), region = 77 }
 0x10d   :  { %408 = vsyncpa [#allocation3], 1 }
 0x10e   :  { %410 = vsyncpa [#allocation3 + $0x1], 1 }

</bundles_post_ra>
